<compile_context>
chip_gen: v5e
topology: v5e:2x2
jax: 0.10.0
libtpu: 0.0.40
codegen_flags: <defaults>
</compile_context>

<pallas_src>
import math

import jax
import jax.numpy as jnp
from jax import lax
from jax.experimental import pallas as pl
from jax.experimental.pallas import tpu as pltpu

# Problem sizes (from the PyTorch module: Conv2d(3, 3, 2); stride 1, no pad).
CIN, H, W = 3, 4, 4
COUT, KH, KW = 3, 2, 2
OH, OW = H - KH + 1, W - KW + 1
K = CIN * KH * KW                       # contraction size = 12

BN_VAR = 0.1
BN_EPS = 1e-5
BN_SCALE = 1.0 / math.sqrt(BN_VAR + BN_EPS)   # running_mean = 0.0, no affine

NB = 128                                # images per grid step (lane-dense tile)


def conv_bn_kernel(w_ref, b_ref, x_ref, o_ref):
    """One batch tile of the fused conv + (BN-folded) bias.

    w_ref: SMEM (COUT, K)              BN-folded conv weights (scalar taps).
    b_ref: SMEM (COUT,)                BN-folded conv bias.
    x_ref: VMEM (CIN, H, W, NB)        input tile, batch on lanes.
    o_ref: VMEM (1, COUT, OH, OW, NB)  output tile, batch on lanes.
    """
    accs = [None] * COUT
    k = 0
    for ci in range(CIN):
        # One lane-dense plane load per input channel, reused for all taps.
        plane = x_ref[ci, :, :, :]                          # (H, W, NB)
        for kh in range(KH):
            for kw in range(KW):
                tap = plane[kh:kh + OH, kw:kw + OW, :]      # (OH, OW, NB)
                for co in range(COUT):
                    term = w_ref[co, k] * tap               # scalar splat * vregs
                    accs[co] = term if accs[co] is None else accs[co] + term
                k += 1
    for co in range(COUT):
        o_ref[0, co, :, :, :] = accs[co] + b_ref[co]        # bias add in f32


def conv_bn(x, weight, bias):
    """x: (N, CIN, H, W); weight: (COUT, CIN, KH, KW); bias: (COUT,)."""
    n = x.shape[0]
    nt = int(pl.cdiv(n, NB))
    npad = nt * NB

    # Wrapper-side layout plumbing: pad batch, put it last (lane axis).
    xp = x.astype(jnp.float32)
    if npad != n:
        xp = jnp.pad(xp, ((0, npad - n), (0, 0), (0, 0), (0, 0)))
    xt = jnp.transpose(xp, (1, 2, 3, 0))                    # (CIN, H, W, npad)

    # Fold the batch-norm scale into the conv parameters (constant folded).
    w2d = (weight.reshape(COUT, K) * BN_SCALE).astype(jnp.float32)
    b1d = (bias * BN_SCALE).astype(jnp.float32)

    out = pl.pallas_call(
        conv_bn_kernel,
        out_shape=jax.ShapeDtypeStruct((nt, COUT, OH, OW, NB), jnp.float32),
        grid=(nt,),
        in_specs=[
            pl.BlockSpec(memory_space=pltpu.MemorySpace.SMEM),      # weights
            pl.BlockSpec(memory_space=pltpu.MemorySpace.SMEM),      # bias
            pl.BlockSpec((CIN, H, W, NB), lambda b: (0, 0, 0, b)),  # batch tile
        ],
        out_specs=pl.BlockSpec((1, COUT, OH, OW, NB),
                               lambda b: (b, 0, 0, 0, 0)),
        compiler_params=pltpu.CompilerParams(
            dimension_semantics=("parallel",)),
    )(w2d, b1d, xt)

    # Un-flatten back to NCHW and drop the batch pad (wrapper-side plumbing).
    out = out.transpose(0, 4, 1, 2, 3).reshape(npad, COUT, OH, OW)
    return out[:n]


def reference(x, weight, bias):
    y = lax.conv_general_dilated(
        x, weight, window_strides=(1, 1), padding="VALID",
        dimension_numbers=("NCHW", "OIHW", "NCHW"))
    y = y + bias[None, :, None, None]
    return y * BN_SCALE


if __name__ == "__main__":
    key = jax.random.PRNGKey(0)
    kx, kw_, kb = jax.random.split(key, 3)

    # Module's conv config is fixed (3->3 channels, 4x4 spatial); a small batch
    # of images amortizes the fixed pallas_call/DMA overhead.
    n_batch = 8
    x = jax.random.normal(kx, (n_batch, CIN, H, W), dtype=jnp.float32)

    # Deterministic Conv2d-style init (uniform in +/- 1/sqrt(fan_in)).
    fan_in = CIN * KH * KW
    bound = 1.0 / math.sqrt(fan_in)
    weight = jax.random.uniform(kw_, (COUT, CIN, KH, KW), jnp.float32,
                                minval=-bound, maxval=bound)
    bias = jax.random.uniform(kb, (COUT,), jnp.float32,
                              minval=-bound, maxval=bound)

    out = jax.block_until_ready(conv_bn(x, weight, bias))

    ref = reference(x, weight, bias)
    assert out.shape == (n_batch, COUT, OH, OW)
    assert jnp.allclose(out, ref, atol=1e-4, rtol=1e-4), "mismatch vs reference"

    print("KERNEL_OK")
</pallas_src>

<mosaic_0001>
module attributes {stable_mosaic.version = 11 : i64} {
  func.func @conv_bn_kernel(%arg0: i32, %arg1: memref<3x12xf32, #tpu.memory_space<smem>>, %arg2: memref<3xf32, #tpu.memory_space<smem>>, %arg3: memref<3x4x4x128xf32, #tpu.memory_space<vmem>>, %arg4: memref<1x3x3x3x128xf32, #tpu.memory_space<vmem>>) attributes {dimension_semantics = [#tpu.dimension_semantics<parallel>], iteration_bounds = array<i64: 1>, scalar_prefetch = 0 : i64, scratch_operands = 0 : i64, tpu.core_type = #tpu.core_type<tc>, window_params = [{transform_indices = @transform_0, window_bounds = array<i64: 3, 12>}, {transform_indices = @transform_1, window_bounds = array<i64: 3>}, {transform_indices = @transform_2, window_bounds = array<i64: 3, 4, 4, 128>}, {transform_indices = @transform_3, window_bounds = array<i64: 1, 3, 3, 3, 128>}]} {
    %c0 = arith.constant 0 : index
    %c0_0 = arith.constant 0 : index
    %c0_1 = arith.constant 0 : index
    %c0_2 = arith.constant 0 : index
    %0 = vector.load %arg3[%c0, %c0_0, %c0_1, %c0_2] : memref<3x4x4x128xf32, #tpu.memory_space<vmem>>, vector<1x4x4x128xf32>
    %1 = vector.shape_cast %0 : vector<1x4x4x128xf32> to vector<4x4x128xf32>
    %2 = vector.extract_strided_slice %1 {offsets = [0, 0, 0], sizes = [3, 3, 128], strides = [1, 1, 1]} : vector<4x4x128xf32> to vector<3x3x128xf32>
    %c0_3 = arith.constant 0 : index
    %c0_4 = arith.constant 0 : index
    %3 = memref.load %arg1[%c0_3, %c0_4] : memref<3x12xf32, #tpu.memory_space<smem>>
    %4 = vector.broadcast %3 : f32 to vector<3x3x128xf32>
    %5 = arith.mulf %4, %2 : vector<3x3x128xf32>
    %c1 = arith.constant 1 : index
    %c0_5 = arith.constant 0 : index
    %6 = memref.load %arg1[%c1, %c0_5] : memref<3x12xf32, #tpu.memory_space<smem>>
    %7 = vector.broadcast %6 : f32 to vector<3x3x128xf32>
    %8 = arith.mulf %7, %2 : vector<3x3x128xf32>
    %c2 = arith.constant 2 : index
    %c0_6 = arith.constant 0 : index
    %9 = memref.load %arg1[%c2, %c0_6] : memref<3x12xf32, #tpu.memory_space<smem>>
    %10 = vector.broadcast %9 : f32 to vector<3x3x128xf32>
    %11 = arith.mulf %10, %2 : vector<3x3x128xf32>
    %12 = vector.extract_strided_slice %1 {offsets = [0, 1, 0], sizes = [3, 3, 128], strides = [1, 1, 1]} : vector<4x4x128xf32> to vector<3x3x128xf32>
    %c0_7 = arith.constant 0 : index
    %c1_8 = arith.constant 1 : index
    %13 = memref.load %arg1[%c0_7, %c1_8] : memref<3x12xf32, #tpu.memory_space<smem>>
    %14 = vector.broadcast %13 : f32 to vector<3x3x128xf32>
    %15 = arith.mulf %14, %12 : vector<3x3x128xf32>
    %16 = arith.addf %5, %15 : vector<3x3x128xf32>
    %c1_9 = arith.constant 1 : index
    %c1_10 = arith.constant 1 : index
    %17 = memref.load %arg1[%c1_9, %c1_10] : memref<3x12xf32, #tpu.memory_space<smem>>
    %18 = vector.broadcast %17 : f32 to vector<3x3x128xf32>
    %19 = arith.mulf %18, %12 : vector<3x3x128xf32>
    %20 = arith.addf %8, %19 : vector<3x3x128xf32>
    %c2_11 = arith.constant 2 : index
    %c1_12 = arith.constant 1 : index
    %21 = memref.load %arg1[%c2_11, %c1_12] : memref<3x12xf32, #tpu.memory_space<smem>>
    %22 = vector.broadcast %21 : f32 to vector<3x3x128xf32>
    %23 = arith.mulf %22, %12 : vector<3x3x128xf32>
    %24 = arith.addf %11, %23 : vector<3x3x128xf32>
    %25 = vector.extract_strided_slice %1 {offsets = [1, 0, 0], sizes = [3, 3, 128], strides = [1, 1, 1]} : vector<4x4x128xf32> to vector<3x3x128xf32>
    %c0_13 = arith.constant 0 : index
    %c2_14 = arith.constant 2 : index
    %26 = memref.load %arg1[%c0_13, %c2_14] : memref<3x12xf32, #tpu.memory_space<smem>>
    %27 = vector.broadcast %26 : f32 to vector<3x3x128xf32>
    %28 = arith.mulf %27, %25 : vector<3x3x128xf32>
    %29 = arith.addf %16, %28 : vector<3x3x128xf32>
    %c1_15 = arith.constant 1 : index
    %c2_16 = arith.constant 2 : index
    %30 = memref.load %arg1[%c1_15, %c2_16] : memref<3x12xf32, #tpu.memory_space<smem>>
    %31 = vector.broadcast %30 : f32 to vector<3x3x128xf32>
    %32 = arith.mulf %31, %25 : vector<3x3x128xf32>
    %33 = arith.addf %20, %32 : vector<3x3x128xf32>
    %c2_17 = arith.constant 2 : index
    %c2_18 = arith.constant 2 : index
    %34 = memref.load %arg1[%c2_17, %c2_18] : memref<3x12xf32, #tpu.memory_space<smem>>
    %35 = vector.broadcast %34 : f32 to vector<3x3x128xf32>
    %36 = arith.mulf %35, %25 : vector<3x3x128xf32>
    %37 = arith.addf %24, %36 : vector<3x3x128xf32>
    %38 = vector.extract_strided_slice %1 {offsets = [1, 1, 0], sizes = [3, 3, 128], strides = [1, 1, 1]} : vector<4x4x128xf32> to vector<3x3x128xf32>
    %c0_19 = arith.constant 0 : index
    %c3 = arith.constant 3 : index
    %39 = memref.load %arg1[%c0_19, %c3] : memref<3x12xf32, #tpu.memory_space<smem>>
    %40 = vector.broadcast %39 : f32 to vector<3x3x128xf32>
    %41 = arith.mulf %40, %38 : vector<3x3x128xf32>
    %42 = arith.addf %29, %41 : vector<3x3x128xf32>
    %c1_20 = arith.constant 1 : index
    %c3_21 = arith.constant 3 : index
    %43 = memref.load %arg1[%c1_20, %c3_21] : memref<3x12xf32, #tpu.memory_space<smem>>
    %44 = vector.broadcast %43 : f32 to vector<3x3x128xf32>
    %45 = arith.mulf %44, %38 : vector<3x3x128xf32>
    %46 = arith.addf %33, %45 : vector<3x3x128xf32>
    %c2_22 = arith.constant 2 : index
    %c3_23 = arith.constant 3 : index
    %47 = memref.load %arg1[%c2_22, %c3_23] : memref<3x12xf32, #tpu.memory_space<smem>>
    %48 = vector.broadcast %47 : f32 to vector<3x3x128xf32>
    %49 = arith.mulf %48, %38 : vector<3x3x128xf32>
    %50 = arith.addf %37, %49 : vector<3x3x128xf32>
    %c1_24 = arith.constant 1 : index
    %c0_25 = arith.constant 0 : index
    %c0_26 = arith.constant 0 : index
    %c0_27 = arith.constant 0 : index
    %51 = vector.load %arg3[%c1_24, %c0_25, %c0_26, %c0_27] : memref<3x4x4x128xf32, #tpu.memory_space<vmem>>, vector<1x4x4x128xf32>
    %52 = vector.shape_cast %51 : vector<1x4x4x128xf32> to vector<4x4x128xf32>
    %53 = vector.extract_strided_slice %52 {offsets = [0, 0, 0], sizes = [3, 3, 128], strides = [1, 1, 1]} : vector<4x4x128xf32> to vector<3x3x128xf32>
    %c0_28 = arith.constant 0 : index
    %c4 = arith.constant 4 : index
    %54 = memref.load %arg1[%c0_28, %c4] : memref<3x12xf32, #tpu.memory_space<smem>>
    %55 = vector.broadcast %54 : f32 to vector<3x3x128xf32>
    %56 = arith.mulf %55, %53 : vector<3x3x128xf32>
    %57 = arith.addf %42, %56 : vector<3x3x128xf32>
    %c1_29 = arith.constant 1 : index
    %c4_30 = arith.constant 4 : index
    %58 = memref.load %arg1[%c1_29, %c4_30] : memref<3x12xf32, #tpu.memory_space<smem>>
    %59 = vector.broadcast %58 : f32 to vector<3x3x128xf32>
    %60 = arith.mulf %59, %53 : vector<3x3x128xf32>
    %61 = arith.addf %46, %60 : vector<3x3x128xf32>
    %c2_31 = arith.constant 2 : index
    %c4_32 = arith.constant 4 : index
    %62 = memref.load %arg1[%c2_31, %c4_32] : memref<3x12xf32, #tpu.memory_space<smem>>
    %63 = vector.broadcast %62 : f32 to vector<3x3x128xf32>
    %64 = arith.mulf %63, %53 : vector<3x3x128xf32>
    %65 = arith.addf %50, %64 : vector<3x3x128xf32>
    %66 = vector.extract_strided_slice %52 {offsets = [0, 1, 0], sizes = [3, 3, 128], strides = [1, 1, 1]} : vector<4x4x128xf32> to vector<3x3x128xf32>
    %c0_33 = arith.constant 0 : index
    %c5 = arith.constant 5 : index
    %67 = memref.load %arg1[%c0_33, %c5] : memref<3x12xf32, #tpu.memory_space<smem>>
    %68 = vector.broadcast %67 : f32 to vector<3x3x128xf32>
    %69 = arith.mulf %68, %66 : vector<3x3x128xf32>
    %70 = arith.addf %57, %69 : vector<3x3x128xf32>
    %c1_34 = arith.constant 1 : index
    %c5_35 = arith.constant 5 : index
    %71 = memref.load %arg1[%c1_34, %c5_35] : memref<3x12xf32, #tpu.memory_space<smem>>
    %72 = vector.broadcast %71 : f32 to vector<3x3x128xf32>
    %73 = arith.mulf %72, %66 : vector<3x3x128xf32>
    %74 = arith.addf %61, %73 : vector<3x3x128xf32>
    %c2_36 = arith.constant 2 : index
    %c5_37 = arith.constant 5 : index
    %75 = memref.load %arg1[%c2_36, %c5_37] : memref<3x12xf32, #tpu.memory_space<smem>>
    %76 = vector.broadcast %75 : f32 to vector<3x3x128xf32>
    %77 = arith.mulf %76, %66 : vector<3x3x128xf32>
    %78 = arith.addf %65, %77 : vector<3x3x128xf32>
    %79 = vector.extract_strided_slice %52 {offsets = [1, 0, 0], sizes = [3, 3, 128], strides = [1, 1, 1]} : vector<4x4x128xf32> to vector<3x3x128xf32>
    %c0_38 = arith.constant 0 : index
    %c6 = arith.constant 6 : index
    %80 = memref.load %arg1[%c0_38, %c6] : memref<3x12xf32, #tpu.memory_space<smem>>
    %81 = vector.broadcast %80 : f32 to vector<3x3x128xf32>
    %82 = arith.mulf %81, %79 : vector<3x3x128xf32>
    %83 = arith.addf %70, %82 : vector<3x3x128xf32>
    %c1_39 = arith.constant 1 : index
    %c6_40 = arith.constant 6 : index
    %84 = memref.load %arg1[%c1_39, %c6_40] : memref<3x12xf32, #tpu.memory_space<smem>>
    %85 = vector.broadcast %84 : f32 to vector<3x3x128xf32>
    %86 = arith.mulf %85, %79 : vector<3x3x128xf32>
    %87 = arith.addf %74, %86 : vector<3x3x128xf32>
    %c2_41 = arith.constant 2 : index
    %c6_42 = arith.constant 6 : index
    %88 = memref.load %arg1[%c2_41, %c6_42] : memref<3x12xf32, #tpu.memory_space<smem>>
    %89 = vector.broadcast %88 : f32 to vector<3x3x128xf32>
    %90 = arith.mulf %89, %79 : vector<3x3x128xf32>
    %91 = arith.addf %78, %90 : vector<3x3x128xf32>
    %92 = vector.extract_strided_slice %52 {offsets = [1, 1, 0], sizes = [3, 3, 128], strides = [1, 1, 1]} : vector<4x4x128xf32> to vector<3x3x128xf32>
    %c0_43 = arith.constant 0 : index
    %c7 = arith.constant 7 : index
    %93 = memref.load %arg1[%c0_43, %c7] : memref<3x12xf32, #tpu.memory_space<smem>>
    %94 = vector.broadcast %93 : f32 to vector<3x3x128xf32>
    %95 = arith.mulf %94, %92 : vector<3x3x128xf32>
    %96 = arith.addf %83, %95 : vector<3x3x128xf32>
    %c1_44 = arith.constant 1 : index
    %c7_45 = arith.constant 7 : index
    %97 = memref.load %arg1[%c1_44, %c7_45] : memref<3x12xf32, #tpu.memory_space<smem>>
    %98 = vector.broadcast %97 : f32 to vector<3x3x128xf32>
    %99 = arith.mulf %98, %92 : vector<3x3x128xf32>
    %100 = arith.addf %87, %99 : vector<3x3x128xf32>
    %c2_46 = arith.constant 2 : index
    %c7_47 = arith.constant 7 : index
    %101 = memref.load %arg1[%c2_46, %c7_47] : memref<3x12xf32, #tpu.memory_space<smem>>
    %102 = vector.broadcast %101 : f32 to vector<3x3x128xf32>
    %103 = arith.mulf %102, %92 : vector<3x3x128xf32>
    %104 = arith.addf %91, %103 : vector<3x3x128xf32>
    %c2_48 = arith.constant 2 : index
    %c0_49 = arith.constant 0 : index
    %c0_50 = arith.constant 0 : index
    %c0_51 = arith.constant 0 : index
    %105 = vector.load %arg3[%c2_48, %c0_49, %c0_50, %c0_51] : memref<3x4x4x128xf32, #tpu.memory_space<vmem>>, vector<1x4x4x128xf32>
    %106 = vector.shape_cast %105 : vector<1x4x4x128xf32> to vector<4x4x128xf32>
    %107 = vector.extract_strided_slice %106 {offsets = [0, 0, 0], sizes = [3, 3, 128], strides = [1, 1, 1]} : vector<4x4x128xf32> to vector<3x3x128xf32>
    %c0_52 = arith.constant 0 : index
    %c8 = arith.constant 8 : index
    %108 = memref.load %arg1[%c0_52, %c8] : memref<3x12xf32, #tpu.memory_space<smem>>
    %109 = vector.broadcast %108 : f32 to vector<3x3x128xf32>
    %110 = arith.mulf %109, %107 : vector<3x3x128xf32>
    %111 = arith.addf %96, %110 : vector<3x3x128xf32>
    %c1_53 = arith.constant 1 : index
    %c8_54 = arith.constant 8 : index
    %112 = memref.load %arg1[%c1_53, %c8_54] : memref<3x12xf32, #tpu.memory_space<smem>>
    %113 = vector.broadcast %112 : f32 to vector<3x3x128xf32>
    %114 = arith.mulf %113, %107 : vector<3x3x128xf32>
    %115 = arith.addf %100, %114 : vector<3x3x128xf32>
    %c2_55 = arith.constant 2 : index
    %c8_56 = arith.constant 8 : index
    %116 = memref.load %arg1[%c2_55, %c8_56] : memref<3x12xf32, #tpu.memory_space<smem>>
    %117 = vector.broadcast %116 : f32 to vector<3x3x128xf32>
    %118 = arith.mulf %117, %107 : vector<3x3x128xf32>
    %119 = arith.addf %104, %118 : vector<3x3x128xf32>
    %120 = vector.extract_strided_slice %106 {offsets = [0, 1, 0], sizes = [3, 3, 128], strides = [1, 1, 1]} : vector<4x4x128xf32> to vector<3x3x128xf32>
    %c0_57 = arith.constant 0 : index
    %c9 = arith.constant 9 : index
    %121 = memref.load %arg1[%c0_57, %c9] : memref<3x12xf32, #tpu.memory_space<smem>>
    %122 = vector.broadcast %121 : f32 to vector<3x3x128xf32>
    %123 = arith.mulf %122, %120 : vector<3x3x128xf32>
    %124 = arith.addf %111, %123 : vector<3x3x128xf32>
    %c1_58 = arith.constant 1 : index
    %c9_59 = arith.constant 9 : index
    %125 = memref.load %arg1[%c1_58, %c9_59] : memref<3x12xf32, #tpu.memory_space<smem>>
    %126 = vector.broadcast %125 : f32 to vector<3x3x128xf32>
    %127 = arith.mulf %126, %120 : vector<3x3x128xf32>
    %128 = arith.addf %115, %127 : vector<3x3x128xf32>
    %c2_60 = arith.constant 2 : index
    %c9_61 = arith.constant 9 : index
    %129 = memref.load %arg1[%c2_60, %c9_61] : memref<3x12xf32, #tpu.memory_space<smem>>
    %130 = vector.broadcast %129 : f32 to vector<3x3x128xf32>
    %131 = arith.mulf %130, %120 : vector<3x3x128xf32>
    %132 = arith.addf %119, %131 : vector<3x3x128xf32>
    %133 = vector.extract_strided_slice %106 {offsets = [1, 0, 0], sizes = [3, 3, 128], strides = [1, 1, 1]} : vector<4x4x128xf32> to vector<3x3x128xf32>
    %c0_62 = arith.constant 0 : index
    %c10 = arith.constant 10 : index
    %134 = memref.load %arg1[%c0_62, %c10] : memref<3x12xf32, #tpu.memory_space<smem>>
    %135 = vector.broadcast %134 : f32 to vector<3x3x128xf32>
    %136 = arith.mulf %135, %133 : vector<3x3x128xf32>
    %137 = arith.addf %124, %136 : vector<3x3x128xf32>
    %c1_63 = arith.constant 1 : index
    %c10_64 = arith.constant 10 : index
    %138 = memref.load %arg1[%c1_63, %c10_64] : memref<3x12xf32, #tpu.memory_space<smem>>
    %139 = vector.broadcast %138 : f32 to vector<3x3x128xf32>
    %140 = arith.mulf %139, %133 : vector<3x3x128xf32>
    %141 = arith.addf %128, %140 : vector<3x3x128xf32>
    %c2_65 = arith.constant 2 : index
    %c10_66 = arith.constant 10 : index
    %142 = memref.load %arg1[%c2_65, %c10_66] : memref<3x12xf32, #tpu.memory_space<smem>>
    %143 = vector.broadcast %142 : f32 to vector<3x3x128xf32>
    %144 = arith.mulf %143, %133 : vector<3x3x128xf32>
    %145 = arith.addf %132, %144 : vector<3x3x128xf32>
    %146 = vector.extract_strided_slice %106 {offsets = [1, 1, 0], sizes = [3, 3, 128], strides = [1, 1, 1]} : vector<4x4x128xf32> to vector<3x3x128xf32>
    %c0_67 = arith.constant 0 : index
    %c11 = arith.constant 11 : index
    %147 = memref.load %arg1[%c0_67, %c11] : memref<3x12xf32, #tpu.memory_space<smem>>
    %148 = vector.broadcast %147 : f32 to vector<3x3x128xf32>
    %149 = arith.mulf %148, %146 : vector<3x3x128xf32>
    %150 = arith.addf %137, %149 : vector<3x3x128xf32>
    %c1_68 = arith.constant 1 : index
    %c11_69 = arith.constant 11 : index
    %151 = memref.load %arg1[%c1_68, %c11_69] : memref<3x12xf32, #tpu.memory_space<smem>>
    %152 = vector.broadcast %151 : f32 to vector<3x3x128xf32>
    %153 = arith.mulf %152, %146 : vector<3x3x128xf32>
    %154 = arith.addf %141, %153 : vector<3x3x128xf32>
    %c2_70 = arith.constant 2 : index
    %c11_71 = arith.constant 11 : index
    %155 = memref.load %arg1[%c2_70, %c11_71] : memref<3x12xf32, #tpu.memory_space<smem>>
    %156 = vector.broadcast %155 : f32 to vector<3x3x128xf32>
    %157 = arith.mulf %156, %146 : vector<3x3x128xf32>
    %158 = arith.addf %145, %157 : vector<3x3x128xf32>
    %c0_72 = arith.constant 0 : index
    %159 = memref.load %arg2[%c0_72] : memref<3xf32, #tpu.memory_space<smem>>
    %160 = vector.broadcast %159 : f32 to vector<3x3x128xf32>
    %161 = arith.addf %150, %160 : vector<3x3x128xf32>
    %c0_73 = arith.constant 0 : index
    %c0_74 = arith.constant 0 : index
    %c0_75 = arith.constant 0 : index
    %c0_76 = arith.constant 0 : index
    %c0_77 = arith.constant 0 : index
    %162 = vector.load %arg4[%c0_73, %c0_74, %c0_75, %c0_76, %c0_77] : memref<1x3x3x3x128xf32, #tpu.memory_space<vmem>>, vector<1x1x3x3x128xf32>
    %163 = vector.shape_cast %162 : vector<1x1x3x3x128xf32> to vector<3x3x128xf32>
    %164 = vector.shape_cast %161 : vector<3x3x128xf32> to vector<1x1x3x3x128xf32>
    tpu.vector_store %arg4[%c0_73, %c0_74, %c0_75, %c0_76, %c0_77], %164 {strides = array<i32>} : memref<1x3x3x3x128xf32, #tpu.memory_space<vmem>>, vector<1x1x3x3x128xf32>,
    %c1_78 = arith.constant 1 : index
    %165 = memref.load %arg2[%c1_78] : memref<3xf32, #tpu.memory_space<smem>>
    %166 = vector.broadcast %165 : f32 to vector<3x3x128xf32>
    %167 = arith.addf %154, %166 : vector<3x3x128xf32>
    %c0_79 = arith.constant 0 : index
    %c1_80 = arith.constant 1 : index
    %c0_81 = arith.constant 0 : index
    %c0_82 = arith.constant 0 : index
    %c0_83 = arith.constant 0 : index
    %168 = vector.load %arg4[%c0_79, %c1_80, %c0_81, %c0_82, %c0_83] : memref<1x3x3x3x128xf32, #tpu.memory_space<vmem>>, vector<1x1x3x3x128xf32>
    %169 = vector.shape_cast %168 : vector<1x1x3x3x128xf32> to vector<3x3x128xf32>
    %170 = vector.shape_cast %167 : vector<3x3x128xf32> to vector<1x1x3x3x128xf32>
    tpu.vector_store %arg4[%c0_79, %c1_80, %c0_81, %c0_82, %c0_83], %170 {strides = array<i32>} : memref<1x3x3x3x128xf32, #tpu.memory_space<vmem>>, vector<1x1x3x3x128xf32>,
    %c2_84 = arith.constant 2 : index
    %171 = memref.load %arg2[%c2_84] : memref<3xf32, #tpu.memory_space<smem>>
    %172 = vector.broadcast %171 : f32 to vector<3x3x128xf32>
    %173 = arith.addf %158, %172 : vector<3x3x128xf32>
    %c0_85 = arith.constant 0 : index
    %c2_86 = arith.constant 2 : index
    %c0_87 = arith.constant 0 : index
    %c0_88 = arith.constant 0 : index
    %c0_89 = arith.constant 0 : index
    %174 = vector.load %arg4[%c0_85, %c2_86, %c0_87, %c0_88, %c0_89] : memref<1x3x3x3x128xf32, #tpu.memory_space<vmem>>, vector<1x1x3x3x128xf32>
    %175 = vector.shape_cast %174 : vector<1x1x3x3x128xf32> to vector<3x3x128xf32>
    %176 = vector.shape_cast %173 : vector<3x3x128xf32> to vector<1x1x3x3x128xf32>
    tpu.vector_store %arg4[%c0_85, %c2_86, %c0_87, %c0_88, %c0_89], %176 {strides = array<i32>} : memref<1x3x3x3x128xf32, #tpu.memory_space<vmem>>, vector<1x1x3x3x128xf32>,
    return
  }
  func.func @transform_0(%arg0: i32) -> (i32, i32) {
    %c0_i32 = arith.constant 0 : i32
    %c0_i32_0 = arith.constant 0 : i32
    %c0_i32_1 = arith.constant 0 : i32
    return %c0_i32, %c0_i32_0 : i32, i32
  }
  func.func @transform_1(%arg0: i32) -> i32 {
    %c0_i32 = arith.constant 0 : i32
    %c0_i32_0 = arith.constant 0 : i32
    return %c0_i32 : i32
  }
  func.func @transform_2(%arg0: i32) -> (i32, i32, i32, i32) {
    %c0_i32 = arith.constant 0 : i32
    %c0_i32_0 = arith.constant 0 : i32
    %c0_i32_1 = arith.constant 0 : i32
    %c0_i32_2 = arith.constant 0 : i32
    return %c0_i32, %c0_i32_0, %c0_i32_1, %arg0 : i32, i32, i32, i32
  }
  func.func @transform_3(%arg0: i32) -> (i32, i32, i32, i32, i32) {
    %c0_i32 = arith.constant 0 : i32
    %c0_i32_0 = arith.constant 0 : i32
    %c0_i32_1 = arith.constant 0 : i32
    %c0_i32_2 = arith.constant 0 : i32
    %c0_i32_3 = arith.constant 0 : i32
    return %arg0, %c0_i32, %c0_i32_0, %c0_i32_1, %c0_i32_2 : i32, i32, i32, i32, i32
  }
}

</mosaic_0001>

<bundles_post_ra>
// kernel: tpu_custom_call.1
= control target key start
LH: loop header
LB: loop body
LE: loop exit
PB: predicated region body
PF: predicated region fallthrough
CT: control target
= control target key end

     0   :  { %8 = vsyncpa [#allocation4], 0  ;;  %s1085_s0 = inlined_call_operand.hbm [shape: f32[3,12], index: 0, kind: input, shape index: {}]   ;;  %s1086_s1 = inlined_call_operand.hbm [shape: f32[3], index: 1, kind: input, shape index: {}]   ;;  %s1087_s2 = inlined_call_operand.hbm [shape: f32[3,4,4,128], index: 2, kind: input, shape index: {}]   ;;  %s1088_s3 = inlined_call_operand.vmem [shape: f32[1,3,3,3,128], index: 3, kind: output, shape index: {}]  }
   0x1   :  { %9 = vsyncpa [#allocation6], 0  ;;  %s16_s14 = sshll.u32 %s1085_s0, 4  ;;  %s17_s14 = int_to_ptr.hbm [resolvable:$true] %s16_s14 }
   0x2   :  { %10 = vsyncpa [#allocation3], 0  ;;  %s25_s17 = sshll.u32 %s1086_s1, 4  ;;  %s645_s18 = smov [#allocation2]   ;;  %s26_s17 = int_to_ptr.hbm [resolvable:$true] %s25_s17 }
   0x3   :  { %19 = dma.hbm_to_smem %s17_s14, 64, %s645_s18, [#allocation4]  }
   0x4   :  { %s646_s19 = smov [#allocation5]   ;;  %s33_s22 = sshll.u32 %s1087_s2, 4  ;;  %s34_s22 = int_to_ptr.hbm [resolvable:$true] %s33_s22 }
   0x5   :  { %28 = dma.hbm_to_smem %s26_s17, 16, %s646_s19, [#allocation6]  }
   0x6   :  { %s647_s23 = smov [#allocation7]   ;;  %s648_s0 = smov 64  }
   0x7   :  { %s35_s24 = sshll.u32 %s647_s23, 4  ;;  %s649_s25 = smov 4   ;;  %s36_s24 = int_to_ptr.vmem [resolvable:$true] %s35_s24 }
   0x8   :  { %41 = dma.hbm_to_vmem [thread:$0]  %s34_s22, 768, %s36_s24, [#allocation3], %s648_s0, %s648_s0, %s649_s25  }
   0x9   :  { %639 = dma.done.wait [#allocation4], 64  }
   0xa   :  { %640 = vsyncadd [#allocation4], 4294967232 }
   0xb   :  { %641 = dma.done.wait [#allocation6], 16  }
   0xc   :  { %642 = vsyncadd [#allocation6], 4294967280 }
   0xd   :  { %643 = dma.done.wait [#allocation3], 768  }
   0xe   :  { %644 = vsyncadd [#allocation3], 4294966528 }
   0xf   :  { %54 = sfence }
  0x10   :  { %s59_s1 = sld [smem:[#allocation2]]  ;;  %v679_v0 = vld [vmem:[#allocation7] sm:$0xf]  ;;  %v681_v1 = vld [vmem:[#allocation7 + $0x4] sm:$0xf] }
  0x11   :  { %s545_s26 = sld [smem:[#allocation2 + $0x1]]  ;;  %v693_v10 = vld [vmem:[#allocation7 + $0x10] sm:$0xf]  ;;  %v697_v11 = vld [vmem:[#allocation7 + $0x8] sm:$0xf] }
  0x12   :  { %s548_s27 = sld [smem:[#allocation2 + $0x2]]  ;;  %v706_v17 = vld [vmem:[#allocation7 + $0x14] sm:$0xf]  ;;  %v721_v28 = vld [vmem:[#allocation7 + $0x20] sm:$0xf] }
  0x13   :  { %s551_s28 = sld [smem:[#allocation2 + $0x3]]  ;;  %v723_v31 = vld [vmem:[#allocation7 + $0xc] sm:$0xf]  ;;  %v744_v51 = vld [vmem:[#allocation7 + $0x24] sm:$0xf] }
  0x14   :  { %s554_s29 = sld [smem:[#allocation2 + $0x4]]  ;;  %v747_v53 = vld [vmem:[#allocation7 + $0x18] sm:$0xf]  ;;  %v762_v62 = vld [vmem:[#allocation7 + $0x28] sm:$0xf] }
  0x15   :  { %s557_s2 = sld [smem:[#allocation2 + $0x5]] }
  0x16   :  { %v60_v2 = vstv %s59_s1  ;;  %s683_s30 = sld [smem:[#allocation2 + $0x6]] }
  0x17   :  { %v75_v3 = vstv %s545_s26  ;;  %s563_s4 = sld [smem:[#allocation2 + $0x7]]  ;;  %v61_v4 = vmul.f32 %v60_v2, %v679_v0  ;;  %v62_v12 = vmul.f32 %v60_v2, %v681_v1  ;;  %v63_v21 = vmul.f32 %v60_v2, %v697_v11 }
  0x18   :  { %v76_v5 = vmul.f32 %v75_v3, %v679_v0  ;;  %v126_v6 = vstv %s548_s27  ;;  %s687_s5 = sld [smem:[#allocation2 + $0x8]]  ;;  %v77_v7 = vmul.f32 %v75_v3, %v681_v1  ;;  %v78_v25 = vmul.f32 %v75_v3, %v697_v11 }
  0x19   :  { %v127_v8 = vmul.f32 %v126_v6, %v681_v1  ;;  %v691_v9 = vstv %s551_s28  ;;  %s695_s6 = sld [smem:[#allocation2 + $0x9]]  ;;  %v128_v19 = vmul.f32 %v126_v6, %v697_v11  ;;  %v129_v43 = vmul.f32 %v126_v6, %v723_v31 }
  0x1a   :  { %v82_v13 = vrot.slane %v76_v5, 1  ;;  %v151_v14 = vmul.f32 %v691_v9, %v681_v1  ;;  %v702_v15 = vstv %s554_s29  ;;  %s704_s7 = sld [smem:[#allocation2 + $0xa]]  ;;  %v83_v16 = vrot.slane %v77_v7, 1  ;;  %v768_v5 = vld [vmem:[#allocation7 + $0x1c] sm:$0xf] }
  0x1b   :  { %v708_v18 = vstv %s557_s2  ;;  %s575_s8 = sld [smem:[#allocation2 + $0xb]]  ;;  %v152_v20 = vmul.f32 %v691_v9, %v697_v11  ;;  %v207_v26 = vmul.f32 %v702_v15, %v693_v10  ;;  %v208_v35 = vmul.f32 %v702_v15, %v706_v17 }
  0x1c   :  { %v88_v22 = vadd.f32 %v82_v13, %v61_v4  ;;  %v157_v23 = vrot.slane %v151_v14, 1  ;;  %v231_v24 = vmul.f32 %v708_v18, %v693_v10  ;;  %s716_s9 = sld [smem:[#allocation5]]  ;;  %v89_v29 = vadd.f32 %v83_v16, %v62_v12 }
  0x1d   :  { %v305_v27 = vstv %s563_s4  ;;  %v158_v30 = vrot.slane %v152_v20, 1  ;;  %v281_v33 = vstv %s683_s30  ;;  %v232_v39 = vmul.f32 %v708_v18, %v706_v17  ;;  %s755_s10 = sld [smem:[#allocation2 + $0x80]] }
  0x1e   :  { %v130_v32 = vadd.f32 %v127_v8, %v88_v22  ;;  %v306_v34 = vmul.f32 %v305_v27, %v706_v17  ;;  %v361_v36 = vstv %s687_s5  ;;  %v131_v38 = vadd.f32 %v128_v19, %v89_v29  ;;  %s764_s11 = sld [smem:[#allocation2 + $0x81]] }
  0x1f   :  { %v731_v37 = vstv %s695_s6  ;;  %v237_v41 = vrot.slane %v231_v24, 1  ;;  %v238_v47 = vrot.slane %v232_v39, 1  ;;  %v282_v49 = vmul.f32 %v281_v33, %v706_v17  ;;  %s770_s12 = sld [smem:[#allocation2 + $0x82]] }
  0x20   :  { %v163_v40 = vadd.f32 %v157_v23, %v130_v32  ;;  %v386_v42 = vmul.f32 %v731_v37, %v721_v28  ;;  %v739_v44 = vstv %s704_s7  ;;  %v164_v46 = vadd.f32 %v158_v30, %v131_v38  ;;  %s777_s13 = sld [smem:[#allocation2 + $0x83]] }
  0x21   :  { %v741_v45 = vstv %s575_s8  ;;  %v312_v50 = vrot.slane %v306_v34, 1  ;;  %v362_v52 = vmul.f32 %v361_v36, %v721_v28  ;;  %v283_v56 = vmul.f32 %v281_v33, %v747_v53  ;;  %s782_s14 = sld [smem:[#allocation2 + $0x84]] }
  0x22   :  { %v210_v48 = vadd.f32 %v207_v26, %v163_v40  ;;  %v751_v54 = vmul.f32 %v741_v45, %v744_v51  ;;  %v211_v55 = vadd.f32 %v208_v35, %v164_v46  ;;  %v307_v57 = vmul.f32 %v305_v27, %v747_v53  ;;  %s787_s15 = sld [smem:[#allocation2 + $0x85]] }
  0x23   :  { %v392_v59 = vrot.slane %v386_v42, 1  ;;  %v437_v60 = vmul.f32 %v739_v44, %v744_v51  ;;  %v760_v61 = vstv %s716_s9  ;;  %v387_v3 = vmul.f32 %v731_v37, %v744_v51  ;;  %s792_s16 = sld [smem:[#allocation2 + $0x87]] }
  0x24   :  { %v243_v58 = vadd.f32 %v237_v41, %v210_v48  ;;  %v244_v63 = vadd.f32 %v238_v47, %v211_v55  ;;  %v313_v2 = vrot.slane %v307_v57, 1  ;;  %v84_v4 = vrot.slane %v78_v25, 1  ;;  %s805_s17 = sld [smem:[#allocation2 + $0x86]] }
  0x25   :  { %v363_v7 = vmul.f32 %v361_v36, %v744_v51  ;;  %v462_v8 = vmul.f32 %v741_v45, %v762_v62  ;;  %v153_v12 = vmul.f32 %v691_v9, %v723_v31  ;;  %v467_v13 = vrot.slane %v751_v54, 1  ;;  %s811_s18 = sld [smem:[#allocation2 + $0x89]] }
  0x26   :  { %v285_v6 = vadd.f32 %v282_v49, %v243_v58  ;;  %v286_v14 = vadd.f32 %v283_v56, %v244_v63  ;;  %v90_v16 = vadd.f32 %v84_v4, %v63_v21  ;;  %v233_v19 = vmul.f32 %v708_v18, %v747_v53  ;;  %s823_s19 = sld [smem:[#allocation2 + $0x8b]] }
  0x27   :  { %v438_v22 = vmul.f32 %v739_v44, %v762_v62  ;;  %v159_v23 = vrot.slane %v153_v12, 1  ;;  %v308_v24 = vmul.f32 %v305_v27, %v768_v5  ;;  %v393_v25 = vrot.slane %v387_v3, 1  ;;  %v794_v27 = vld [vmem:[#allocation7 + $0x2c] sm:$0xf]  ;;  %s567_s20 = sld [smem:[#allocation2 + $0x88]] }
  0x28   :  { %v318_v20 = vadd.f32 %v312_v50, %v285_v6  ;;  %v319_v9 = vadd.f32 %v313_v2, %v286_v14  ;;  %v132_v26 = vadd.f32 %v129_v43, %v90_v16  ;;  %v209_v21 = vmul.f32 %v702_v15, %v747_v53  ;;  %s573_s21 = sld [smem:[#allocation2 + $0x8a]] }
  0x29   :  { %v468_v29 = vrot.slane %v462_v8, 1  ;;  %v239_v30 = vrot.slane %v233_v19, 1  ;;  %v284_v32 = vmul.f32 %v281_v33, %v768_v5  ;;  %v364_v38 = vmul.f32 %v361_v36, %v762_v62  ;;  %s578_s22 = sld [smem:[#allocation5 + $0x1]] }
  0x2a   :  { %v365_v18 = vadd.f32 %v362_v52, %v318_v20  ;;  %v366_v34 = vadd.f32 %v363_v7, %v319_v9  ;;  %v165_v35 = vadd.f32 %v159_v23, %v132_v26  ;;  %v798_v39 = vstv %s755_s10  ;;  %s885_s1 = sld [smem:[#allocation2 + $0x100]] }
  0x2b   :  { %v314_v41 = vrot.slane %v308_v24, 1  ;;  %v388_v15 = vmul.f32 %v731_v37, %v762_v62  ;;  %v803_v42 = vstv %s764_s11  ;;  %v66_v46 = vmul.f32 %v798_v39, %v679_v0  ;;  %s892_s26 = sld [smem:[#allocation2 + $0x101]] }
  0x2c   :  { %v398_v40 = vadd.f32 %v392_v59, %v365_v18  ;;  %v399_v33 = vadd.f32 %v393_v25, %v366_v34  ;;  %v212_v43 = vadd.f32 %v209_v21, %v165_v35  ;;  %v93_v36 = vmul.f32 %v803_v42, %v679_v0  ;;  %s900_s27 = sld [smem:[#allocation2 + $0x102]] }
  0x2d   :  { %v463_v37 = vmul.f32 %v741_v45, %v794_v27  ;;  %v816_v48 = vstv %s770_s12  ;;  %v819_v49 = vstv %s777_s13  ;;  %v828_v58 = vstv %s782_s14  ;;  %s911_s2 = sld [smem:[#allocation2 + $0x103]] }
  0x2e   :  { %v440_v47 = vadd.f32 %v437_v60, %v398_v40  ;;  %v441_v50 = vadd.f32 %v438_v22, %v399_v33  ;;  %v245_v52 = vadd.f32 %v239_v30, %v212_v43  ;;  %v99_v54 = vrot.slane %v93_v36, 1  ;;  %s917_s30 = sld [smem:[#allocation2 + $0x105]] }
  0x2f   :  { %v135_v55 = vmul.f32 %v816_v48, %v681_v1  ;;  %v168_v57 = vmul.f32 %v819_v49, %v681_v1  ;;  %v831_v45 = vstv %s787_s15  ;;  %v394_v4 = vrot.slane %v388_v15, 1  ;;  %s923_s4 = sld [smem:[#allocation2 + $0x104]] }
  0x30   :  { %v473_v56 = vadd.f32 %v467_v13, %v440_v47  ;;  %v474_v59 = vadd.f32 %v468_v29, %v441_v50  ;;  %v287_v60 = vadd.f32 %v284_v32, %v245_v52  ;;  %v105_v63 = vadd.f32 %v99_v54, %v66_v46  ;;  %s928_s5 = sld [smem:[#allocation2 + $0x107]] }
  0x31   :  { %v248_v2 = vmul.f32 %v831_v45, %v693_v10  ;;  %v174_v6 = vrot.slane %v168_v57, 1  ;;  %v837_v7 = vstv %s792_s16  ;;  %v215_v14 = vmul.f32 %v828_v58, %v693_v10  ;;  %s941_s6 = sld [smem:[#allocation2 + $0x106]] }
  0x32   :  { %v512_v3 = vadd.f32 %v760_v61, %v473_v56  ;;  %v513_v8 = vadd.f32 %v760_v61, %v474_v59  ;;  %v320_v12 = vadd.f32 %v314_v41, %v287_v60  ;;  %v138_v13 = vadd.f32 %v135_v55, %v105_v63  ;;  %s956_s7 = sld [smem:[#allocation2 + $0x109]] }
  0x33   :  { %v439_v16 = vmul.f32 %v739_v44, %v794_v27  ;;  %v254_v19 = vrot.slane %v248_v2, 1  ;;  %v848_v20 = vstv %s805_s17  ;;  %v323_v24 = vmul.f32 %v837_v7, %v706_v17  ;;  %s964_s8 = sld [smem:[#allocation2 + $0x108]] }
  0x34   :  { %515 = vst [vmem:[%s1088_s3] sm:$0x7] %v512_v3  ;;  %v367_v22 = vadd.f32 %v364_v38, %v320_v12  ;;  %v180_v23 = vadd.f32 %v174_v6, %v138_v13  ;;  %v856_v9 = vstv %s811_s18  ;;  %v469_v25 = vrot.slane %v463_v37, 1  ;;  %s981_s11 = sld [smem:[#allocation2 + $0x10b]] }
  0x35   :  { %516 = vst [vmem:[%s1088_s3 + $0x4] sm:$0x7] %v513_v8  ;;  %v290_v44 = vmul.f32 %v848_v20, %v706_v17  ;;  %v861_v18 = vstv %s823_s19  ;;  %v863_v29 = vstv %s567_s20  ;;  %v403_v30 = vmul.f32 %v856_v9, %v721_v28  ;;  %s989_s12 = sld [smem:[#allocation2 + $0x10a]] }
  0x36   :  { %v400_v26 = vadd.f32 %v394_v4, %v367_v22  ;;  %v218_v21 = vadd.f32 %v215_v14, %v180_v23  ;;  %v67_v32 = vmul.f32 %v798_v39, %v681_v1  ;;  %v94_v34 = vmul.f32 %v803_v42, %v681_v1  ;;  %s582_s15 = sld [smem:[#allocation5 + $0x2]] }
  0x37   :  { %v329_v40 = vrot.slane %v323_v24, 1  ;;  %v169_v41 = vmul.f32 %v819_v49, %v697_v11  ;;  %v873_v15 = vstv %s573_s21  ;;  %v478_v33 = vmul.f32 %v861_v18, %v744_v51 }
  0x38   :  { %v442_v35 = vadd.f32 %v439_v16, %v400_v26  ;;  %v260_v38 = vadd.f32 %v254_v19, %v218_v21  ;;  %v100_v43 = vrot.slane %v94_v34, 1  ;;  %v136_v46 = vmul.f32 %v816_v48, %v697_v11 }
  0x39   :  { %v370_v37 = vmul.f32 %v863_v29, %v721_v28  ;;  %v881_v50 = vstv %s578_s22  ;;  %v409_v52 = vrot.slane %v403_v30, 1  ;;  %v175_v55 = vrot.slane %v169_v41, 1 }
  0x3a   :  { %v475_v36 = vadd.f32 %v469_v25, %v442_v35  ;;  %v293_v47 = vadd.f32 %v290_v44, %v260_v38  ;;  %v106_v54 = vadd.f32 %v100_v43, %v67_v32  ;;  %v249_v56 = vmul.f32 %v831_v45, %v706_v17 }
  0x3b   :  { %v445_v60 = vmul.f32 %v873_v15, %v744_v51  ;;  %v216_v63 = vmul.f32 %v828_v58, %v706_v17  ;;  %v484_v2 = vrot.slane %v478_v33, 1  ;;  %v324_v4 = vmul.f32 %v837_v7, %v747_v53 }
  0x3c   :  { %v514_v57 = vadd.f32 %v760_v61, %v475_v36  ;;  %v335_v59 = vadd.f32 %v329_v40, %v293_v47  ;;  %v139_v3 = vadd.f32 %v136_v46, %v106_v54  ;;  %v898_v6 = vmul.f32 %v856_v9, %v744_v51 }
  0x3d   :  { %v68_v8 = vmul.f32 %v798_v39, %v697_v11  ;;  %v95_v12 = vmul.f32 %v803_v42, %v697_v11  ;;  %v170_v13 = vmul.f32 %v819_v49, %v723_v31  ;;  %v255_v16 = vrot.slane %v249_v56, 1 }
  0x3e   :  { %517 = vst [vmem:[%s1088_s3 + $0x8] sm:$0x7] %v514_v57  ;;  %v373_v61 = vadd.f32 %v370_v37, %v335_v59  ;;  %v181_v14 = vadd.f32 %v175_v55, %v139_v3  ;;  %v291_v19 = vmul.f32 %v848_v20, %v747_v53  ;;  %v371_v22 = vmul.f32 %v863_v29, %v744_v51 }
  0x3f   :  { %v101_v39 = vrot.slane %v95_v12, 1  ;;  %v137_v42 = vmul.f32 %v816_v48, %v723_v31  ;;  %v250_v49 = vmul.f32 %v831_v45, %v747_v53  ;;  %v330_v25 = vrot.slane %v324_v4, 1 }
  0x40   :  { %v415_v23 = vadd.f32 %v409_v52, %v373_v61  ;;  %v219_v24 = vadd.f32 %v216_v63, %v181_v14  ;;  %v410_v26 = vrot.slane %v898_v6, 1  ;;  %v446_v21 = vmul.f32 %v873_v15, %v762_v62 }
  0x41   :  { %v479_v48 = vmul.f32 %v861_v18, %v762_v62  ;;  %v107_v30 = vadd.f32 %v101_v39, %v68_v8  ;;  %v176_v32 = vrot.slane %v170_v13, 1  ;;  %v217_v34 = vmul.f32 %v828_v58, %v747_v53 }
  0x42   :  { %v448_v44 = vadd.f32 %v445_v60, %v415_v23  ;;  %v261_v45 = vadd.f32 %v255_v16, %v219_v24  ;;  %v325_v35 = vmul.f32 %v837_v7, %v768_v5  ;;  %v937_v38 = vstv %s885_s1 }
  0x43   :  { %v140_v41 = vadd.f32 %v137_v42, %v107_v30  ;;  %v256_v33 = vrot.slane %v250_v49, 1  ;;  %v292_v43 = vmul.f32 %v848_v20, %v768_v5  ;;  %v405_v36 = vmul.f32 %v856_v9, %v762_v62 }
  0x44   :  { %v490_v40 = vadd.f32 %v484_v2, %v448_v44  ;;  %v294_v46 = vadd.f32 %v291_v19, %v261_v45  ;;  %v946_v58 = vstv %s892_s26  ;;  %v949_v47 = vstv %s900_s27 }
  0x45   :  { %v182_v37 = vadd.f32 %v176_v32, %v140_v41  ;;  %v71_v52 = vmul.f32 %v937_v38, %v679_v0  ;;  %v110_v20 = vmul.f32 %v946_v58, %v679_v0  ;;  %v331_v55 = vrot.slane %v325_v35, 1 }
  0x46   :  { %v520_v7 = vadd.f32 %v881_v50, %v490_v40  ;;  %v336_v54 = vadd.f32 %v330_v25, %v294_v46  ;;  %v959_v9 = vstv %s911_s2  ;;  %v962_v56 = vstv %s917_s30 }
  0x47   :  { %v220_v57 = vadd.f32 %v217_v34, %v182_v37  ;;  %v116_v59 = vrot.slane %v110_v20, 1  ;;  %v143_v60 = vmul.f32 %v949_v47, %v681_v1  ;;  %v185_v0 = vmul.f32 %v959_v9, %v681_v1 }
  0x48   :  { %579 = vst [vmem:[%s1088_s3 + $0xc] sm:$0x7] %v520_v7  ;;  %v374_v63 = vadd.f32 %v371_v22, %v336_v54  ;;  %v480_v2 = vmul.f32 %v861_v18, %v794_v27  ;;  %v976_v3 = vstv %s923_s4  ;;  %v979_v4 = vstv %s928_s5 }
  0x49   :  { %v262_v6 = vadd.f32 %v256_v33, %v220_v57  ;;  %v122_v61 = vadd.f32 %v116_v59, %v71_v52  ;;  %v191_v8 = vrot.slane %v185_v0, 1  ;;  %v265_v12 = vmul.f32 %v962_v56, %v693_v10 }
  0x4a   :  { %v416_v13 = vadd.f32 %v410_v26, %v374_v63  ;;  %v485_v14 = vrot.slane %v479_v48, 1  ;;  %v372_v16 = vmul.f32 %v863_v29, %v762_v62  ;;  %v340_v18 = vmul.f32 %v979_v4, %v706_v17 }
  0x4b   :  { %v295_v19 = vadd.f32 %v292_v43, %v262_v6  ;;  %v146_v22 = vadd.f32 %v143_v60, %v122_v61  ;;  %v223_v23 = vmul.f32 %v976_v3, %v693_v10  ;;  %v994_v39 = vstv %s941_s6 }
  0x4c   :  { %v449_v42 = vadd.f32 %v446_v21, %v416_v13  ;;  %v411_v49 = vrot.slane %v405_v36, 1  ;;  %v447_v24 = vmul.f32 %v873_v15, %v794_v27  ;;  %v486_v29 = vrot.slane %v480_v2, 1 }
  0x4d   :  { %v337_v25 = vadd.f32 %v331_v55, %v295_v19  ;;  %v197_v26 = vadd.f32 %v191_v8, %v146_v22  ;;  %v271_v44 = vrot.slane %v265_v12, 1  ;;  %v999_v48 = vstv %s956_s7 }
  0x4e   :  { %v491_v30 = vadd.f32 %v485_v14, %v449_v42  ;;  %v298_v32 = vmul.f32 %v994_v39, %v706_v17  ;;  %v346_v45 = vrot.slane %v340_v18, 1  ;;  %v1004_v10 = vstv %s964_s8 }
  0x4f   :  { %v375_v21 = vadd.f32 %v372_v16, %v337_v25  ;;  %v226_v34 = vadd.f32 %v223_v23, %v197_v26  ;;  %v72_v15 = vmul.f32 %v937_v38, %v681_v1  ;;  %v111_v35 = vmul.f32 %v946_v58, %v681_v1 }
  0x50   :  { %v521_v40 = vadd.f32 %v881_v50, %v491_v30  ;;  %v420_v41 = vmul.f32 %v999_v48, %v721_v28  ;;  %v1014_v33 = vstv %s981_s11  ;;  %v186_v43 = vmul.f32 %v959_v9, %v697_v11 }
  0x51   :  { %v417_v46 = vadd.f32 %v411_v49, %v375_v21  ;;  %v277_v36 = vadd.f32 %v271_v44, %v226_v34  ;;  %v117_v7 = vrot.slane %v111_v35, 1  ;;  %v144_v37 = vmul.f32 %v949_v47, %v697_v11 }
  0x52   :  { %580 = vst [vmem:[%s1088_s3 + $0x10] sm:$0x7] %v521_v40  ;;  %v378_v1 = vmul.f32 %v1004_v10, %v721_v28  ;;  %v1026_v52 = vstv %s989_s12  ;;  %v192_v20 = vrot.slane %v186_v43, 1  ;;  %v266_v59 = vmul.f32 %v962_v56, %v706_v17 }
  0x53   :  { %v450_v54 = vadd.f32 %v447_v24, %v417_v46  ;;  %v301_v55 = vadd.f32 %v298_v32, %v277_v36  ;;  %v123_v57 = vadd.f32 %v117_v7, %v72_v15  ;;  %v426_v60 = vrot.slane %v420_v41, 1 }
  0x54   :  { %v495_v0 = vmul.f32 %v1014_v33, %v744_v51  ;;  %v224_v28 = vmul.f32 %v976_v3, %v706_v17  ;;  %v453_v61 = vmul.f32 %v1026_v52, %v744_v51  ;;  %v341_v8 = vmul.f32 %v979_v4, %v747_v53 }
  0x55   :  { %v492_v63 = vadd.f32 %v486_v29, %v450_v54  ;;  %v352_v2 = vadd.f32 %v346_v45, %v301_v55  ;;  %v147_v6 = vadd.f32 %v144_v37, %v123_v57  ;;  %v73_v12 = vmul.f32 %v937_v38, %v697_v11 }
  0x56   :  { %v112_v13 = vmul.f32 %v946_v58, %v697_v11  ;;  %v272_v19 = vrot.slane %v266_v59, 1  ;;  %v145_v17 = vmul.f32 %v949_v47, %v723_v31  ;;  %v187_v23 = vmul.f32 %v959_v9, %v723_v31 }
  0x57   :  { %v522_v14 = vadd.f32 %v881_v50, %v492_v63  ;;  %v381_v16 = vadd.f32 %v378_v1, %v352_v2  ;;  %v198_v18 = vadd.f32 %v192_v20, %v147_v6  ;;  %v501_v42 = vrot.slane %v495_v0, 1 }
  0x58   :  { %v118_v22 = vrot.slane %v112_v13, 1  ;;  %v299_v11 = vmul.f32 %v994_v39, %v747_v53  ;;  %v193_v58 = vrot.slane %v187_v23, 1  ;;  %v267_v24 = vmul.f32 %v962_v56, %v747_v53 }
  0x59   :  { %581 = vst [vmem:[%s1088_s3 + $0x14] sm:$0x7] %v522_v14  ;;  %v432_v38 = vadd.f32 %v426_v60, %v381_v16  ;;  %v227_v49 = vadd.f32 %v224_v28, %v198_v18  ;;  %v347_v25 = vrot.slane %v341_v8, 1  ;;  %v421_v31 = vmul.f32 %v999_v48, %v744_v51 }
  0x5a   :  { %v124_v50 = vadd.f32 %v118_v22, %v73_v12  ;;  %v528_v9 = vstv %s582_s15  ;;  %v225_v44 = vmul.f32 %v976_v3, %v747_v53  ;;  %v379_v45 = vmul.f32 %v1004_v10, %v744_v51 }
  0x5b   :  { %v456_v29 = vadd.f32 %v453_v61, %v432_v38  ;;  %v278_v47 = vadd.f32 %v272_v19, %v227_v49  ;;  %v273_v34 = vrot.slane %v267_v24, 1  ;;  %v342_v56 = vmul.f32 %v979_v4, %v768_v5 }
  0x5c   :  { %v148_v26 = vadd.f32 %v145_v17, %v124_v50  ;;  %v427_v40 = vrot.slane %v421_v31, 1  ;;  %v496_v41 = vmul.f32 %v1014_v33, %v762_v62  ;;  %v300_v53 = vmul.f32 %v994_v39, %v768_v5 }
  0x5d   :  { %v507_v30 = vadd.f32 %v501_v42, %v456_v29  ;;  %v302_v32 = vadd.f32 %v299_v11, %v278_v47  ;;  %v454_v3 = vmul.f32 %v1026_v52, %v762_v62  ;;  %v348_v4 = vrot.slane %v342_v56, 1 }
  0x5e   :  { %v199_v21 = vadd.f32 %v193_v58, %v148_v26  ;;  %v422_v36 = vmul.f32 %v999_v48, %v762_v62  ;;  %v502_v37 = vrot.slane %v496_v41, 1  ;;  %v380_v20 = vmul.f32 %v1004_v10, %v762_v62 }
  0x5f   :  { %v529_v15 = vadd.f32 %v528_v9, %v507_v30  ;;  %v353_v35 = vadd.f32 %v347_v25, %v302_v32  ;;  %v497_v55 = vmul.f32 %v1014_v33, %v794_v27  ;;  %v455_v60 = vmul.f32 %v1026_v52, %v794_v27 }
  0x60   :  { %v228_v43 = vadd.f32 %v225_v44, %v199_v21  ;;  %v428_v54 = vrot.slane %v422_v36, 1 }
  0x61   :  { %583 = vst [vmem:[%s1088_s3 + $0x18] sm:$0x7] %v529_v15  ;;  %v382_v51 = vadd.f32 %v379_v45, %v353_v35  ;;  %v503_v48 = vrot.slane %v497_v55, 1 }
  0x62   :  { %v279_v46 = vadd.f32 %v273_v34, %v228_v43 }
  0x63   :  { %v433_v7 = vadd.f32 %v427_v40, %v382_v51 }
  0x64   :  { %v303_v1 = vadd.f32 %v300_v53, %v279_v46 }
  0x65   :  { %v457_v5 = vadd.f32 %v454_v3, %v433_v7 }
  0x66   :  { %v354_v39 = vadd.f32 %v348_v4, %v303_v1 }
  0x67   :  { %v508_v57 = vadd.f32 %v502_v37, %v457_v5 }
  0x68   :  { %v383_v59 = vadd.f32 %v380_v20, %v354_v39 }
  0x69   :  { %v530_v0 = vadd.f32 %v528_v9, %v508_v57 }
  0x6a   :  { %v434_v63 = vadd.f32 %v428_v54, %v383_v59 }
  0x6b   :  { %584 = vst [vmem:[%s1088_s3 + $0x1c] sm:$0x7] %v530_v0 }
  0x6c   :  { %v458_v2 = vadd.f32 %v455_v60, %v434_v63 }
  0x6e   :  { %v509_v62 = vadd.f32 %v503_v48, %v458_v2 }
  0x70   :  { %v531_v10 = vadd.f32 %v528_v9, %v509_v62 }
  0x72   :  { %585 = vst [vmem:[%s1088_s3 + $0x20] sm:$0x7] %v531_v10 }
  0x73   :  { %540 = vsyncpa [#allocation3], 1 }
  0x74   :  { %541 = vsyncpa [#allocation4], 1 }
  0x75   :  { %542 = vsyncpa [#allocation6], 1 }

</bundles_post_ra>
